<compile_context>
chip_gen: v7x
topology: tpu7x:2x2x1
jax: 0.10.0
libtpu: 0.0.40
codegen_flags: <defaults>
</compile_context>

<pallas_src>
import functools

import jax
import jax.numpy as jnp
from jax import lax
from jax.experimental import pallas as pl
from jax.experimental.pallas import tpu as pltpu


def _round_up(x, m):
    return (x + m - 1) // m * m


def _cosine_classifier_kernel(f_ref, wt_ref, sqw_ref, g_ref, logits_ref, *raw_refs,
                              scaling, gamma, eps):
    """One batch tile: normalize features, -stable_cosine_distance, softmax proxy-merge."""
    f = f_ref[...].astype(jnp.float32)                          # (TB, Dp)

    # scaling * L2-normalize(features). rsqrt goes to the EUP; one broadcast multiply
    # replaces sqrt + full-tile divide.  1/max(||f||, eps) == min(rsqrt(||f||^2), 1/eps).
    f_ss = jnp.sum(f * f, axis=-1, keepdims=True)               # (TB, 1)
    f_inv = jnp.minimum(lax.rsqrt(f_ss), 1.0 / eps)             # (TB, 1)
    f_n = f * (scaling * f_inv)                                 # (TB, Dp)
    # exact ||f_n||^2 from the cached sum of squares (no second reduction over D)
    sq_f = (scaling * scaling) * f_ss * (f_inv * f_inv)         # (TB, 1)

    # Transpose-free MXU matmul against pre-normalized, pre-transposed weights (Dp, Pp).
    # (Inputs are f32 here; for bf16 feature/weight dtypes cast the operands and keep
    #  preferred_element_type=f32 to exploit the bf16 MXU path on v6e/v7x.)
    cross = jnp.dot(f_n, wt_ref[...], preferred_element_type=jnp.float32)   # (TB, Pp)

    # -stable_cosine_distance; sqw_ref holds exact ||w_n||^2 per proxy (1, Pp).
    dist = jnp.maximum(sq_f + sqw_ref[...] - 2.0 * cross, 0.0)
    raw = -dist                                                 # (TB, Pp)
    if raw_refs:                                                # optional raw_logits output
        raw_refs[0][...] = raw.astype(raw_refs[0].dtype)

    # _reduce_proxies(merging='softmax') as two one-hot group matmuls:
    #   logits[:, c] = sum_{p in c} raw*e / sum_{p in c} e ,  e = exp(gamma*raw - shift).
    # A single per-row max over all proxies is a valid shared shift (softmax is
    # shift-invariant within each group) and keeps every exponent <= 0.
    g = gamma * raw
    e = jnp.exp(g - jnp.max(g, axis=-1, keepdims=True))         # (TB, Pp), one EUP pass
    grp = g_ref[...]                                            # (Pp, Cp) one-hot groups
    num = jnp.dot(raw * e, grp, preferred_element_type=jnp.float32)   # (TB, Cp)
    den = jnp.dot(e, grp, preferred_element_type=jnp.float32)         # (TB, Cp)
    den = jnp.maximum(den, 1e-30)              # padded class columns have den == 0
    inv = pl.reciprocal(den, approx=True)      # EUP vrcp (free bundle slot)
    inv = inv * (2.0 - den * inv)              # two Newton steps -> full f32 accuracy
    inv = inv * (2.0 - den * inv)
    logits_ref[...] = (num * inv).astype(logits_ref.dtype)


def cosine_classifier_forward(features, weights, *, n_classes, proxy_per_class,
                              scaling=1.0, gamma=1.0, block_b=256, return_raw=True):
    """features: (B, D); weights: (n_classes*proxy_per_class, D).  Returns dict like the module."""
    B, D = features.shape
    P, Dw = weights.shape
    assert Dw == D and P == n_classes * proxy_per_class
    eps = 1e-12  # torch.nn.functional.normalize default

    # ---- Hoisted, batch-invariant preprocessing (plain XLA, amortized across calls) ----
    w32 = weights.astype(jnp.float32)
    w_norm = jnp.sqrt(jnp.sum(w32 * w32, axis=-1, keepdims=True))
    w_n = scaling * w32 / jnp.maximum(w_norm, eps)              # (P, D) scaled+normalized
    sq_w = jnp.sum(w_n * w_n, axis=-1)                          # (P,) exact ||w_n||^2

    # Lane-dense padding: contraction dim and every minor output dim -> multiples of 128.
    Dp = _round_up(D, 128)
    Pp = _round_up(P, 128)
    Cp = _round_up(n_classes, 128)
    TB = min(block_b, _round_up(B, 8))
    Bp = _round_up(B, TB)

    f_p = jnp.zeros((Bp, Dp), features.dtype).at[:B, :D].set(features)
    wt_p = jnp.zeros((Dp, Pp), jnp.float32).at[:D, :P].set(w_n.T)   # pre-transposed
    sqw_p = jnp.zeros((1, Pp), jnp.float32).at[0, :P].set(sq_w)

    # One-hot proxy -> class group matrix (padded rows / columns are all zero).
    pid = jnp.arange(Pp)
    cid = jnp.arange(Cp)
    grp = (pid[:, None] // proxy_per_class) == cid[None, :]
    grp = grp & (pid[:, None] < P) & (cid[None, :] < n_classes)
    grp = grp.astype(jnp.float32)                                # (Pp, Cp)

    kernel = functools.partial(_cosine_classifier_kernel,
                               scaling=float(scaling), gamma=float(gamma), eps=eps)

    out_shape = [jax.ShapeDtypeStruct((Bp, Cp), jnp.float32)]
    out_specs = [pl.BlockSpec((TB, Cp), lambda i: (i, 0))]
    if return_raw:
        out_shape.append(jax.ShapeDtypeStruct((Bp, Pp), jnp.float32))
        out_specs.append(pl.BlockSpec((TB, Pp), lambda i: (i, 0)))

    outs = pl.pallas_call(
        kernel,
        grid=(Bp // TB,),
        in_specs=[
            pl.BlockSpec((TB, Dp), lambda i: (i, 0)),    # features: tiled over batch
            pl.BlockSpec((Dp, Pp), lambda i: (0, 0)),    # normalized weights^T: resident
            pl.BlockSpec((1, Pp), lambda i: (0, 0)),     # ||w_n||^2 row: resident
            pl.BlockSpec((Pp, Cp), lambda i: (0, 0)),    # one-hot group matrix: resident
        ],
        out_specs=tuple(out_specs),
        out_shape=tuple(out_shape),
        compiler_params=pltpu.CompilerParams(
            dimension_semantics=("parallel",)),          # batch axis shards across TCs on v7x
    )(f_p, wt_p, sqw_p, grp)

    result = {'logits': outs[0][:B, :n_classes]}
    if return_raw:
        result['raw_logits'] = outs[1][:B, :P]
    return result


def _reference_forward(features, weights, *, n_classes, proxy_per_class,
                       scaling=1.0, gamma=1.0):
    """Pure-JAX reference mirroring the PyTorch module."""
    eps = 1e-12
    f = scaling * features / jnp.maximum(
        jnp.linalg.norm(features, axis=-1, keepdims=True), eps)
    w = scaling * weights / jnp.maximum(
        jnp.linalg.norm(weights, axis=-1, keepdims=True), eps)
    dist = (jnp.sum(f * f, -1, keepdims=True) + jnp.sum(w * w, -1)[None, :]
            - 2.0 * f @ w.T)
    raw = -jnp.maximum(dist, 0.0)
    s = raw.reshape(features.shape[0], n_classes, proxy_per_class)
    att = jax.nn.softmax(gamma * s, axis=-1)
    logits = jnp.sum(s * att, axis=-1)
    return logits, raw


if __name__ == "__main__":
    # Small deterministic config.
    B, D = 8, 32                    # batch, features_dim
    n_classes, proxy_per_class = 4, 10
    scaling, gamma = 1.0, 1.0
    P = n_classes * proxy_per_class

    key = jax.random.PRNGKey(0)
    kf, kw = jax.random.split(key)
    features = jax.random.normal(kf, (B, D), dtype=jnp.float32)
    # add_classes() uses kaiming_normal_(nonlinearity='relu'): std = sqrt(2 / fan_in).
    weights = jax.random.normal(kw, (P, D), dtype=jnp.float32) * jnp.sqrt(2.0 / D)

    out = cosine_classifier_forward(features, weights,
                                    n_classes=n_classes,
                                    proxy_per_class=proxy_per_class,
                                    scaling=scaling, gamma=gamma)
    jax.block_until_ready(out)

    ref_logits, ref_raw = _reference_forward(features, weights,
                                             n_classes=n_classes,
                                             proxy_per_class=proxy_per_class,
                                             scaling=scaling, gamma=gamma)
    assert jnp.allclose(out['raw_logits'], ref_raw, atol=1e-5), "raw_logits mismatch"
    assert jnp.allclose(out['logits'], ref_logits, atol=1e-4, rtol=1e-4), "logits mismatch"
    print("KERNEL_OK")
</pallas_src>

<mosaic_0001>
module attributes {stable_mosaic.version = 11 : i64} {
  func.func @_cosine_classifier_kernel(%arg0: i32, %arg1: memref<8x128xf32, #tpu.memory_space<vmem>>, %arg2: memref<128x128xf32, #tpu.memory_space<vmem>>, %arg3: memref<1x128xf32, #tpu.memory_space<vmem>>, %arg4: memref<128x128xf32, #tpu.memory_space<vmem>>, %arg5: memref<8x128xf32, #tpu.memory_space<vmem>>, %arg6: memref<8x128xf32, #tpu.memory_space<vmem>>) attributes {dimension_semantics = [#tpu.dimension_semantics<parallel>], iteration_bounds = array<i64: 1>, scalar_prefetch = 0 : i64, scratch_operands = 0 : i64, tpu.core_type = #tpu.core_type<tc>, window_params = [{transform_indices = @transform_0, window_bounds = array<i64: 8, 128>}, {pipeline_mode = #tpu.pipeline_mode<synchronous>, transform_indices = @transform_1, window_bounds = array<i64: 128, 128>}, {pipeline_mode = #tpu.pipeline_mode<synchronous>, transform_indices = @transform_2, window_bounds = array<i64: 1, 128>}, {pipeline_mode = #tpu.pipeline_mode<synchronous>, transform_indices = @transform_3, window_bounds = array<i64: 128, 128>}, {transform_indices = @transform_4, window_bounds = array<i64: 8, 128>}, {transform_indices = @transform_5, window_bounds = array<i64: 8, 128>}]} {
    %c0 = arith.constant 0 : index
    %c0_0 = arith.constant 0 : index
    %0 = vector.load %arg1[%c0, %c0_0] : memref<8x128xf32, #tpu.memory_space<vmem>>, vector<8x128xf32>
    %1 = arith.mulf %0, %0 : vector<8x128xf32>
    %cst = arith.constant dense<0.000000e+00> : vector<8xf32>
    %2 = vector.multi_reduction <add>, %1, %cst [1] : vector<8x128xf32> to vector<8xf32>
    %3 = vector.shape_cast %2 : vector<8xf32> to vector<8x1xf32>
    %4 = math.rsqrt %3 : vector<8x1xf32>
    %cst_1 = arith.constant 9.99999995E+11 : f32
    %5 = vector.broadcast %cst_1 : f32 to vector<8x1xf32>
    %6 = arith.minimumf %4, %5 : vector<8x1xf32>
    %cst_2 = arith.constant 1.000000e+00 : f32
    %7 = vector.broadcast %cst_2 : f32 to vector<8x1xf32>
    %8 = arith.mulf %7, %6 : vector<8x1xf32>
    %9 = vector.broadcast %8 : vector<8x1xf32> to vector<8x128xf32>
    %10 = arith.mulf %0, %9 : vector<8x128xf32>
    %cst_3 = arith.constant 1.000000e+00 : f32
    %11 = vector.broadcast %cst_3 : f32 to vector<8x1xf32>
    %12 = arith.mulf %11, %3 : vector<8x1xf32>
    %13 = arith.mulf %6, %6 : vector<8x1xf32>
    %14 = arith.mulf %12, %13 : vector<8x1xf32>
    %c0_4 = arith.constant 0 : index
    %c0_5 = arith.constant 0 : index
    %15 = vector.load %arg2[%c0_4, %c0_5] : memref<128x128xf32, #tpu.memory_space<vmem>>, vector<128x128xf32>
    %cst_6 = arith.constant dense<0.000000e+00> : vector<8x128xf32>
    %16 = tpu.matmul %10, %15, %cst_6 {dimension_numbers = #tpu.dot_dimension_numbers<[1], [0], [0], [1], [0, 0, 1, 1], [], []>} : vector<8x128xf32>, vector<128x128xf32>, vector<8x128xf32> -> vector<8x128xf32>
    %c0_7 = arith.constant 0 : index
    %c0_8 = arith.constant 0 : index
    %17 = vector.load %arg3[%c0_7, %c0_8] : memref<1x128xf32, #tpu.memory_space<vmem>>, vector<1x128xf32>
    %18 = vector.broadcast %14 : vector<8x1xf32> to vector<8x128xf32>
    %19 = vector.broadcast %17 : vector<1x128xf32> to vector<8x128xf32>
    %20 = arith.addf %18, %19 : vector<8x128xf32>
    %cst_9 = arith.constant 2.000000e+00 : f32
    %21 = vector.broadcast %cst_9 : f32 to vector<8x128xf32>
    %22 = arith.mulf %21, %16 : vector<8x128xf32>
    %23 = arith.subf %20, %22 : vector<8x128xf32>
    %cst_10 = arith.constant 0.000000e+00 : f32
    %24 = vector.broadcast %cst_10 : f32 to vector<8x128xf32>
    %25 = arith.maximumf %23, %24 : vector<8x128xf32>
    %cst_11 = arith.constant 0.000000e+00 : f32
    %26 = vector.broadcast %cst_11 : f32 to vector<8x128xf32>
    %27 = arith.subf %26, %25 : vector<8x128xf32>
    %c0_12 = arith.constant 0 : index
    %c0_13 = arith.constant 0 : index
    %28 = vector.load %arg6[%c0_12, %c0_13] : memref<8x128xf32, #tpu.memory_space<vmem>>, vector<8x128xf32>
    tpu.vector_store %arg6[%c0_12, %c0_13], %27 {strides = array<i32>} : memref<8x128xf32, #tpu.memory_space<vmem>>, vector<8x128xf32>,
    %cst_14 = arith.constant 1.000000e+00 : f32
    %29 = vector.broadcast %cst_14 : f32 to vector<8x128xf32>
    %30 = arith.mulf %29, %27 : vector<8x128xf32>
    %cst_15 = arith.constant dense<0xFF800000> : vector<8xf32>
    %31 = vector.multi_reduction <maximumf>, %30, %cst_15 [1] : vector<8x128xf32> to vector<8xf32>
    %32 = vector.shape_cast %31 : vector<8xf32> to vector<8x1xf32>
    %33 = vector.broadcast %32 : vector<8x1xf32> to vector<8x128xf32>
    %34 = arith.subf %30, %33 : vector<8x128xf32>
    %35 = math.exp %34 : vector<8x128xf32>
    %c0_16 = arith.constant 0 : index
    %c0_17 = arith.constant 0 : index
    %36 = vector.load %arg4[%c0_16, %c0_17] : memref<128x128xf32, #tpu.memory_space<vmem>>, vector<128x128xf32>
    %37 = arith.mulf %27, %35 : vector<8x128xf32>
    %cst_18 = arith.constant dense<0.000000e+00> : vector<8x128xf32>
    %38 = tpu.matmul %37, %36, %cst_18 {dimension_numbers = #tpu.dot_dimension_numbers<[1], [0], [0], [1], [0, 0, 1, 1], [], []>} : vector<8x128xf32>, vector<128x128xf32>, vector<8x128xf32> -> vector<8x128xf32>
    %cst_19 = arith.constant dense<0.000000e+00> : vector<8x128xf32>
    %39 = tpu.matmul %35, %36, %cst_19 {dimension_numbers = #tpu.dot_dimension_numbers<[1], [0], [0], [1], [0, 0, 1, 1], [], []>} : vector<8x128xf32>, vector<128x128xf32>, vector<8x128xf32> -> vector<8x128xf32>
    %cst_20 = arith.constant 1.000000e-30 : f32
    %40 = vector.broadcast %cst_20 : f32 to vector<8x128xf32>
    %41 = arith.maximumf %39, %40 : vector<8x128xf32>
    %42 = tpu.reciprocal %41 {approx = true} : vector<8x128xf32> -> vector<8x128xf32>
    %43 = arith.mulf %41, %42 : vector<8x128xf32>
    %cst_21 = arith.constant 2.000000e+00 : f32
    %44 = vector.broadcast %cst_21 : f32 to vector<8x128xf32>
    %45 = arith.subf %44, %43 : vector<8x128xf32>
    %46 = arith.mulf %42, %45 : vector<8x128xf32>
    %47 = arith.mulf %41, %46 : vector<8x128xf32>
    %cst_22 = arith.constant 2.000000e+00 : f32
    %48 = vector.broadcast %cst_22 : f32 to vector<8x128xf32>
    %49 = arith.subf %48, %47 : vector<8x128xf32>
    %50 = arith.mulf %46, %49 : vector<8x128xf32>
    %51 = arith.mulf %38, %50 : vector<8x128xf32>
    %c0_23 = arith.constant 0 : index
    %c0_24 = arith.constant 0 : index
    %52 = vector.load %arg5[%c0_23, %c0_24] : memref<8x128xf32, #tpu.memory_space<vmem>>, vector<8x128xf32>
    tpu.vector_store %arg5[%c0_23, %c0_24], %51 {strides = array<i32>} : memref<8x128xf32, #tpu.memory_space<vmem>>, vector<8x128xf32>,
    return
  }
  func.func @transform_0(%arg0: i32) -> (i32, i32) {
    %c0_i32 = arith.constant 0 : i32
    %c0_i32_0 = arith.constant 0 : i32
    return %arg0, %c0_i32 : i32, i32
  }
  func.func @transform_1(%arg0: i32) -> (i32, i32) {
    %c0_i32 = arith.constant 0 : i32
    %c0_i32_0 = arith.constant 0 : i32
    %c0_i32_1 = arith.constant 0 : i32
    return %c0_i32, %c0_i32_0 : i32, i32
  }
  func.func @transform_2(%arg0: i32) -> (i32, i32) {
    %c0_i32 = arith.constant 0 : i32
    %c0_i32_0 = arith.constant 0 : i32
    %c0_i32_1 = arith.constant 0 : i32
    return %c0_i32, %c0_i32_0 : i32, i32
  }
  func.func @transform_3(%arg0: i32) -> (i32, i32) {
    %c0_i32 = arith.constant 0 : i32
    %c0_i32_0 = arith.constant 0 : i32
    %c0_i32_1 = arith.constant 0 : i32
    return %c0_i32, %c0_i32_0 : i32, i32
  }
  func.func @transform_4(%arg0: i32) -> (i32, i32) {
    %c0_i32 = arith.constant 0 : i32
    %c0_i32_0 = arith.constant 0 : i32
    return %arg0, %c0_i32 : i32, i32
  }
  func.func @transform_5(%arg0: i32) -> (i32, i32) {
    %c0_i32 = arith.constant 0 : i32
    %c0_i32_0 = arith.constant 0 : i32
    return %arg0, %c0_i32 : i32, i32
  }
}

</mosaic_0001>

<bundles_post_ra>
// kernel: tpu_custom_call.1
= control target key start
LH: loop header
LB: loop body
LE: loop exit
PB: predicated region body
PF: predicated region fallthrough
CT: control target
= control target key end

     0   :  { %11 = vsyncpa [#allocation3], 0  ;;  %s866_s0 = inlined_call_operand.hbm [shape: f32[8,128], index: 0, kind: input, shape index: {}]   ;;  %s867_s1 = inlined_call_operand.hbm [shape: f32[128,128], index: 1, kind: input, shape index: {}]   ;;  %s868_s2 = inlined_call_operand.vmem [shape: f32[1,128], index: 2, kind: input, shape index: {}]   ;;  %s869_s3 = inlined_call_operand.hbm [shape: f32[128,128], index: 3, kind: input, shape index: {}]   ;;  %s870_s4 = inlined_call_operand.hbm [shape: f32[8,128], index: 4, kind: output, shape index: {0}]   ;;  %s871_s5 = inlined_call_operand.hbm [shape: f32[8,128], index: 5, kind: output, shape index: {1}]  }
   0x1   :  { %12 = vsyncpa [#allocation6], 0 }
   0x2   :  { %13 = vsyncpa [#allocation4], 0 }
   0x3   :  { %14 = vsyncpa [#allocation10], 0  ;;  %s733_s18 = smov [#allocation5]   ;;  %s615_s22 = scalar_lea.hbm %s867_s1, 2048 }
   0x4   :  { %s30_s19 = sshll.u32 %s733_s18, 4  ;;  %p616_p0 = scmp.ne.s32.totalorder %s867_s1, %s615_s22  ;;  %s31_s19 = int_to_ptr.vmem [resolvable:$true] %s30_s19 }
   0x5   :  { %p619_p1 = scmp.lt.u32.totalorder %s615_s22, %s867_s1 }
   0x7   :  { %p621_p2 = pnand %p619_p1, %p616_p0 }
   0x9   :  { %624 = shalt.err (!%p621_p2)
}
   0xa   :  { %s625_s27 = scalar_lea.vmem %s31_s19, 2048  ;;  %p630_p4 = scmp.lt.s32.totalorder %s31_s19, %s31_s19 }
   0xb   :  { %p626_p3 = scmp.ne.s32.totalorder %s31_s19, %s625_s27  ;;  %p631_p5 = scmp.lt.s32.totalorder %s625_s27, %s625_s27 }
   0xd   :  { %p632_p6 = por %p631_p5, %p630_p4 }
   0xf   :  { %p633_p7 = pnand %p632_p6, %p626_p3 }
  0x11   :  { %636 = shalt.err (!%p633_p7)
}
  0x12   :  { %s734_s28 = smov 128   ;;  %s735_s29 = smov 8  }
  0x13   :  { %36 = dma.hbm_to_vmem [thread:$0]  %s867_s1, 2048, %s31_s19, [#allocation6], %s734_s28, %s734_s28, %s735_s29  }
  0x14   :  { %s736_s7 = smov [#allocation2]   ;;  %s737_s9 = smov [#allocation7]  }
  0x15   :  { %s21_s8 = sshll.u32 %s736_s7, 4  ;;  %s44_s10 = sshll.u32 %s737_s9, 4  ;;  %s22_s8 = int_to_ptr.vmem [resolvable:$true] %s21_s8  ;;  %s45_s10 = int_to_ptr.vmem [resolvable:$true] %s44_s10 }
  0x16   :  { %s637_s13 = scalar_lea.hbm %s866_s0, 128 }
  0x17   :  { %p638_p8 = scmp.ne.s32.totalorder %s866_s0, %s637_s13  ;;  %p641_p9 = scmp.lt.u32.totalorder %s637_s13, %s866_s0 }
  0x19   :  { %p643_p10 = pnand %p641_p9, %p638_p8 }
  0x1b   :  { %646 = shalt.err (!%p643_p10)
}
  0x1c   :  { %s647_s1 = scalar_lea.vmem %s22_s8, 128  ;;  %p652_p12 = scmp.lt.s32.totalorder %s22_s8, %s22_s8 }
  0x1d   :  { %p648_p11 = scmp.ne.s32.totalorder %s22_s8, %s647_s1  ;;  %p653_p13 = scmp.lt.s32.totalorder %s647_s1, %s647_s1 }
  0x1f   :  { %p654_p0 = por %p653_p13, %p652_p12 }
  0x21   :  { %p655_p1 = pnand %p654_p0, %p648_p11 }
  0x23   :  { %658 = shalt.err (!%p655_p1)
}
  0x24   :  { %24 = dma.hbm_to_vmem [thread:$0]  %s866_s0, 128, %s22_s8, [#allocation3]  }
  0x25   :  { %s659_s22 = scalar_lea.hbm %s869_s3, 2048 }
  0x26   :  { %p660_p2 = scmp.ne.s32.totalorder %s869_s3, %s659_s22  ;;  %p663_p3 = scmp.lt.u32.totalorder %s659_s22, %s869_s3 }
  0x28   :  { %p665_p4 = pnand %p663_p3, %p660_p2 }
  0x2a   :  { %668 = shalt.err (!%p665_p4)
}
  0x2b   :  { %s669_s27 = scalar_lea.vmem %s45_s10, 2048  ;;  %p674_p6 = scmp.lt.s32.totalorder %s45_s10, %s45_s10 }
  0x2c   :  { %p670_p5 = scmp.ne.s32.totalorder %s45_s10, %s669_s27  ;;  %p675_p7 = scmp.lt.s32.totalorder %s669_s27, %s669_s27 }
  0x2e   :  { %p676_p8 = por %p675_p7, %p674_p6 }
  0x30   :  { %p677_p9 = pnand %p676_p8, %p670_p5 }
  0x32   :  { %680 = shalt.err (!%p677_p9)
}
  0x33   :  { %50 = dma.hbm_to_vmem [thread:$0]  %s869_s3, 2048, %s45_s10, [#allocation6], %s734_s28, %s734_s28, %s735_s29  }
  0x34   :  { %725 = dma.done.wait [#allocation3], 128  }
  0x35   :  { %726 = vsyncadd [#allocation3], 4294967168 }
  0x36   :  { %727 = dma.done.wait [#allocation6], 4096  }
  0x37   :  { %728 = vsyncadd [#allocation6], 4294963200  ;;  %v738_v0 = vmov 0.0|0.0   ;;  %v60_v1 = vld [vmem:[#allocation2] sm:$0xff]  ;;  %v69_v2 = vld [vmem:[#allocation5] sm:$0xff]  ;;  %vm739_vm0 = vmmov 0  }
  0x38   :  { %527 = vmatprep.subr.bf16.mxu0 %v738_v0  ;;  %551 = vmatprep.subr.bf16.mxu1 %v738_v0  ;;  %v70_v3 = vld [vmem:[#allocation5 + $0x8] sm:$0xff]  ;;  %v61_v4 = vmul.f32 %v60_v1, %v60_v1  ;;  %v71_v6 = vld [vmem:[#allocation5 + $0x10] sm:$0xff]  ;;  %v72_v7 = vld [vmem:[#allocation5 + $0x18] sm:$0xff]  ;;  %v740_v27 = vmov 0.0  }
  0x39   :  { %v528_v5 = vpack.c.bf16 %v70_v3, %v69_v2  ;;  %v531_v8 = vpack.c.bf16 %v72_v7, %v71_v6  ;;  %v73_v9 = vld [vmem:[#allocation5 + $0x20] sm:$0xff]  ;;  %v74_v10 = vld [vmem:[#allocation5 + $0x28] sm:$0xff]  ;;  %v75_v12 = vld [vmem:[#allocation5 + $0x30] sm:$0xff]  ;;  %454 = vmatprep.mubr.msk.f32.mxu0 %vm739_vm0, %v740_v27  ;;  %489 = vmatprep.mubr.msk.f32.mxu1 %vm739_vm0, %v740_v27 }
  0x3a   :  { %62 = vadd.xlane.f32.xlu0 %v61_v4  ;;  %v534_v11 = vpack.c.bf16 %v74_v10, %v73_v9  ;;  %v76_v13 = vld [vmem:[#allocation5 + $0x38] sm:$0xff]  ;;  %v77_v15 = vld [vmem:[#allocation5 + $0x40] sm:$0xff]  ;;  %v78_v16 = vld [vmem:[#allocation5 + $0x48] sm:$0xff] }
  0x3b   :  { %529 = vmatpush3.bf16.msra.mxu0 %v528_v5  ;;  %v537_v14 = vpack.c.bf16 %v76_v13, %v75_v12  ;;  %v540_v17 = vpack.c.bf16 %v78_v16, %v77_v15  ;;  %v79_v18 = vld [vmem:[#allocation5 + $0x50] sm:$0xff]  ;;  %v80_v19 = vld [vmem:[#allocation5 + $0x58] sm:$0xff]  ;;  %v81_v21 = vld [vmem:[#allocation5 + $0x60] sm:$0xff] }
  0x3c   :  { %530 = vmatprep.subr.bf16.mxu0 %v738_v0  ;;  %v543_v20 = vpack.c.bf16 %v80_v19, %v79_v18  ;;  %v82_v22 = vld [vmem:[#allocation5 + $0x68] sm:$0xff]  ;;  %v83_v24 = vld [vmem:[#allocation5 + $0x70] sm:$0xff]  ;;  %v84_v25 = vld [vmem:[#allocation5 + $0x78] sm:$0xff] }
  0x3d   :  { %v546_v23 = vpack.c.bf16 %v82_v22, %v81_v21  ;;  %v549_v26 = vpack.c.bf16 %v84_v25, %v83_v24  ;;  %v173_v32 = vld [vmem:[#allocation7] sm:$0xff]  ;;  %v174_v33 = vld [vmem:[#allocation7 + $0x8] sm:$0xff]  ;;  %v175_v34 = vld [vmem:[#allocation7 + $0x10] sm:$0xff] }
  0x3e   :  { %v552_v35 = vpack.c.bf16 %v174_v33, %v173_v32  ;;  %v176_v36 = vld [vmem:[#allocation7 + $0x18] sm:$0xff]  ;;  %v177_v38 = vld [vmem:[#allocation7 + $0x20] sm:$0xff]  ;;  %v178_v39 = vld [vmem:[#allocation7 + $0x28] sm:$0xff] }
  0x3f   :  { %532 = vmatpush3.bf16.msra.mxu0 %v531_v8  ;;  %v555_v37 = vpack.c.bf16 %v176_v36, %v175_v34  ;;  %v558_v40 = vpack.c.bf16 %v178_v39, %v177_v38  ;;  %v179_v41 = vld [vmem:[#allocation7 + $0x30] sm:$0xff]  ;;  %v180_v42 = vld [vmem:[#allocation7 + $0x38] sm:$0xff]  ;;  %v181_v54 = vld [vmem:[#allocation7 + $0x40] sm:$0xff] }
  0x40   :  { %533 = vmatprep.subr.bf16.mxu0 %v738_v0  ;;  %553 = vmatpush3.bf16.msra.mxu1 %v552_v35  ;;  %v561_v43 = vpack.c.bf16 %v180_v42, %v179_v41  ;;  %v370_v46 = vld [vmem:[%s868_s2] ss:$0 sm:$0xff]  ;;  %v182_v55 = vld [vmem:[#allocation7 + $0x48] sm:$0xff]  ;;  %v183_v57 = vld [vmem:[#allocation7 + $0x50] sm:$0xff]  ;;  %s741_s2 = smov [#allocation9]  }
  0x41   :  { %554 = vmatprep.subr.bf16.mxu1 %v738_v0  ;;  %v564_v56 = vpack.c.bf16 %v182_v55, %v181_v54  ;;  %v184_v58 = vld [vmem:[#allocation7 + $0x58] sm:$0xff]  ;;  %v185_v60 = vld [vmem:[#allocation7 + $0x60] sm:$0xff]  ;;  %v186_v61 = vld [vmem:[#allocation7 + $0x68] sm:$0xff]  ;;  %s356_s29 = sshll.u32 %s741_s2, 4  ;;  %s357_s29 = int_to_ptr.vmem [resolvable:$true] %s356_s29 }
  0x42   :  { %v567_v59 = vpack.c.bf16 %v184_v58, %v183_v57  ;;  %v570_v62 = vpack.c.bf16 %v186_v61, %v185_v60  ;;  %v187_v63 = vld [vmem:[#allocation7 + $0x70] sm:$0xff]  ;;  %s681_s6 = scalar_lea.vmem %s357_s29, 128  ;;  %p686_p11 = scmp.lt.s32.totalorder %s357_s29, %s357_s29 }
  0x43   :  { %535 = vmatpush3.bf16.msra.mxu0 %v534_v11  ;;  %p682_p10 = scmp.ne.s32.totalorder %s357_s29, %s681_s6  ;;  %p687_p12 = scmp.lt.s32.totalorder %s681_s6, %s681_s6 }
  0x44   :  { %536 = vmatprep.subr.bf16.mxu0 %v738_v0  ;;  %556 = vmatpush3.bf16.msra.mxu1 %v555_v37 }
  0x45   :  { %557 = vmatprep.subr.bf16.mxu1 %v738_v0  ;;  %p688_p13 = por %p687_p12, %p686_p11 }
  0x47   :  { %538 = vmatpush3.bf16.msra.mxu0 %v537_v14  ;;  %p689_p0 = pnand %p688_p13, %p682_p10 }
  0x48   :  { %539 = vmatprep.subr.bf16.mxu0 %v738_v0  ;;  %559 = vmatpush3.bf16.msra.mxu1 %v558_v40 }
  0x49   :  { %560 = vmatprep.subr.bf16.mxu1 %v738_v0 }
  0x4b   :  { %541 = vmatpush3.bf16.msra.mxu0 %v540_v17 }
  0x4c   :  { %542 = vmatprep.subr.bf16.mxu0 %v738_v0  ;;  %562 = vmatpush3.bf16.msra.mxu1 %v561_v43 }
  0x4d   :  { %563 = vmatprep.subr.bf16.mxu1 %v738_v0 }
  0x4f   :  { %544 = vmatpush3.bf16.msra.mxu0 %v543_v20 }
  0x50   :  { %545 = vmatprep.subr.bf16.mxu0 %v738_v0  ;;  %565 = vmatpush3.bf16.msra.mxu1 %v564_v56 }
  0x51   :  { %566 = vmatprep.subr.bf16.mxu1 %v738_v0 }
  0x53   :  { %547 = vmatpush3.bf16.msra.mxu0 %v546_v23 }
  0x54   :  { %548 = vmatprep.subr.bf16.mxu0 %v738_v0  ;;  %568 = vmatpush3.bf16.msra.mxu1 %v567_v59 }
  0x55   :  { %569 = vmatprep.subr.bf16.mxu1 %v738_v0 }
  0x57   :  { %550 = vmatpush3.bf16.msra.mxu0 %v549_v26 }
  0x58   :  { %575 = vmatprep.subr.bf16.mxu0 %v738_v0  ;;  %571 = vmatpush3.bf16.msra.mxu1 %v570_v62 }
  0x59   :  { %572 = vmatprep.subr.bf16.mxu1 %v738_v0 }
  0xc7   :  { %v63_v28 = vpop.xlane.xlu0 %62 }
  0xc8   :  { %609 = vrsqrt.f32 %v63_v28 }
  0xd2   :  { %v610_v29 = vpop.eup %609 }
  0xd3   :  { %v65_v30 = vmin.f32 %v610_v29, 1e+12 }
  0xd5   :  { %v66_v31 = vmul.f32 %v65_v30, %v60_v1  ;;  %v67_v44 = vmul.f32 %v65_v30, %v65_v30  ;;  %v188_v1 = vld [vmem:[#allocation7 + $0x78] sm:$0xff] }
  0xd6   :  { %v573_v2 = vpack.c.bf16 %v188_v1, %v187_v63 }
  0xd7   :  { %455 = vmatmul.mubr.f32.vlgmr.msra.gmra.mrb[0].mxu0 %v66_v31  ;;  %v68_v45 = vmul.f32 %v67_v44, %v63_v28 }
  0xd8   :  { %524 = vmatprep.mubr.msk.f32.mxu0 %vm739_vm0, %v740_v27  ;;  %577 = vmatpush3.bf16.msra.mxu0 %v552_v35 }
  0xd9   :  { %578 = vmatprep.subr.bf16.mxu0 %v738_v0  ;;  %v162_v48 = vadd.f32 %v370_v46, %v68_v45  ;;  %574 = vmatpush3.bf16.msra.mxu1 %v573_v2 }
  0xdc   :  { %580 = vmatpush3.bf16.msra.mxu0 %v555_v37 }
  0xdd   :  { %581 = vmatprep.subr.bf16.mxu0 %v738_v0 }
  0xe0   :  { %583 = vmatpush3.bf16.msra.mxu0 %v558_v40 }
  0xe1   :  { %584 = vmatprep.subr.bf16.mxu0 %v738_v0 }
  0xe4   :  { %586 = vmatpush3.bf16.msra.mxu0 %v561_v43 }
  0xe5   :  { %587 = vmatprep.subr.bf16.mxu0 %v738_v0 }
  0xe8   :  { %589 = vmatpush3.bf16.msra.mxu0 %v564_v56 }
  0xe9   :  { %590 = vmatprep.subr.bf16.mxu0 %v738_v0 }
  0xec   :  { %592 = vmatpush3.bf16.msra.mxu0 %v567_v59 }
  0xed   :  { %593 = vmatprep.subr.bf16.mxu0 %v738_v0 }
  0xf0   :  { %595 = vmatpush3.bf16.msra.mxu0 %v570_v62 }
  0xf1   :  { %596 = vmatprep.subr.bf16.mxu0 %v738_v0 }
  0xf4   :  { %598 = vmatpush3.bf16.msra.mxu0 %v573_v2 }
 0x1aa   :  { %v151_v47 = vpop.f32.mrb[0].mxu0 }
 0x1ab   :  { %v163_v49 = vmul.f32 2.0, %v151_v47  ;;  %v456_v50 = vpop.f32.mrb[1].mxu0 }
 0x1ad   :  { %v164_v51 = vsub.f32 %v162_v48, %v163_v49 }
 0x1af   :  { %v165_v52 = vmax.f32 %v164_v51, 0.0 }
 0x1b1   :  { %v166_v53 = vsub.f32 0.0, %v165_v52 }
 0x1b3   :  { %167 = vst [vmem:[#allocation9] sm:$0xff] %v166_v53  ;;  %168 = vmax.xlane.f32.xlu0 %v166_v53 }
 0x240   :  { %v169_v3 = vpop.xlane.xlu0 %168 }
 0x241   :  { %v170_v4 = vsub.f32 %v166_v53, %v169_v3 }
 0x243   :  { %v171_v5 = vmul.f32 1.442695, %v170_v4 }
 0x245   :  { %611 = vpow2.f32 %v171_v5 }
 0x24f   :  { %v612_v6 = vpop.eup %611 }
 0x250   :  { %525 = vmatmul.mubr.f32.vlgmr.msra.gmra.mrb[2].mxu0 %v612_v6  ;;  %v189_v7 = vmul.f32 %v612_v6, %v166_v53 }
 0x252   :  { %490 = vmatmul.mubr.f32.vlgmr.msra.gmra.mrb[0].mxu1 %v189_v7 }
 0x253   :  { %692 = shalt.err (!%p689_p0)
}
 0x254   :  { %s693_s9 = scalar_lea.hbm %s871_s5, 128 }
 0x255   :  { %p694_p1 = scmp.ne.s32.totalorder %s871_s5, %s693_s9  ;;  %p697_p2 = scmp.lt.u32.totalorder %s693_s9, %s871_s5 }
 0x257   :  { %p699_p3 = pnand %p697_p2, %p694_p1 }
 0x259   :  { %702 = shalt.err (!%p699_p3)
}
 0x25a   :  { %359 = dma.vmem_to_hbm [thread:$0]  %s357_s29, 128, %s871_s5, [#allocation10]  }
 0x25b   :  { %s742_s16 = smov [#allocation8]  }
 0x25c   :  { %s346_s17 = sshll.u32 %s742_s16, 4  ;;  %s347_s17 = int_to_ptr.vmem [resolvable:$true] %s346_s17 }
 0x25d   :  { %s703_s1 = scalar_lea.vmem %s347_s17, 128  ;;  %p708_p5 = scmp.lt.s32.totalorder %s347_s17, %s347_s17 }
 0x25e   :  { %p704_p4 = scmp.ne.s32.totalorder %s347_s17, %s703_s1  ;;  %p709_p6 = scmp.lt.s32.totalorder %s703_s1, %s703_s1 }
 0x260   :  { %p710_p7 = por %p709_p6, %p708_p5 }
 0x262   :  { %p711_p8 = pnand %p710_p7, %p704_p4 }
 0x323   :  { %v326_v0 = vpop.f32.mrb[2].mxu0 }
 0x324   :  { %v330_v8 = vmax.f32 %v326_v0, 1e-30  ;;  %v526_v9 = vpop.f32.mrb[3].mxu0 }
 0x325   :  { %v256_v10 = vpop.f32.mrb[0].mxu1 }
 0x326   :  { %613 = vrcp.f32 %v330_v8  ;;  %v491_v11 = vpop.f32.mrb[1].mxu1 }
 0x330   :  { %v614_v12 = vpop.eup %613 }
 0x331   :  { %v332_v13 = vmul.f32 %v614_v12, %v330_v8 }
 0x333   :  { %v333_v14 = vsub.f32 2.0, %v332_v13 }
 0x335   :  { %v334_v15 = vmul.f32 %v614_v12, %v333_v14 }
 0x337   :  { %v335_v16 = vmul.f32 %v334_v15, %v330_v8 }
 0x339   :  { %v336_v17 = vsub.f32 2.0, %v335_v16 }
 0x33b   :  { %v337_v18 = vmul.f32 %v336_v17, %v334_v15 }
 0x33d   :  { %v338_v19 = vmul.f32 %v337_v18, %v256_v10 }
 0x33f   :  { %339 = vst [vmem:[#allocation8] sm:$0xff] %v338_v19 }
 0x340   :  { %714 = shalt.err (!%p711_p8)
}
 0x341   :  { %s715_s19 = scalar_lea.hbm %s870_s4, 128 }
 0x342   :  { %p716_p9 = scmp.ne.s32.totalorder %s870_s4, %s715_s19  ;;  %p719_p10 = scmp.lt.u32.totalorder %s715_s19, %s870_s4 }
 0x344   :  { %p721_p11 = pnand %p719_p10, %p716_p9 }
 0x346   :  { %724 = shalt.err (!%p721_p11)
}
 0x347   :  { %349 = dma.vmem_to_hbm [thread:$0]  %s347_s17, 128, %s870_s4, [#allocation4]  }
 0x348   :  { %729 = dma.done.wait [#allocation4], 128  }
 0x349   :  { %730 = vsyncadd [#allocation4], 4294967168 }
 0x34a   :  { %731 = dma.done.wait [#allocation10], 128  }
 0x34b   :  { %732 = vsyncadd [#allocation10], 4294967168 }
 0x34c   :  { %366 = vsyncpa [#allocation3], 1 }
 0x34d   :  { %367 = vsyncpa [#allocation6], 1 }
 0x34e   :  { %368 = vsyncpa [#allocation4], 1 }
 0x34f   :  { %369 = vsyncpa [#allocation10], 1 }

</bundles_post_ra>
